<compile_context>
chip_gen: v5e
topology: v5e:2x2
jax: 0.10.0
libtpu: 0.0.40
codegen_flags: <defaults>
</compile_context>

<pallas_src>
import functools

import jax
import jax.numpy as jnp
from jax.experimental import pallas as pl
from jax.experimental.pallas import tpu as pltpu


# ----------------------------- sizing helpers ---------------------------------

def _vmem_limit_bytes():
    """Scoped-VMEM limit sized from the device (64 MiB v7x, 128 MiB v5e/v6e)."""
    cap = 64 * 1024 * 1024
    try:
        cap = int(pltpu.get_tpu_info().vmem_capacity_bytes)
    except Exception:
        pass
    return max(32 * 1024 * 1024, min(cap - 16 * 1024 * 1024, 100 * 1024 * 1024))


def _pick_tile(dim, preferred, align):
    """Largest tile <= preferred that is a multiple of `align` and divides dim.
    Falls back to the full dim (a full-extent block is always legal)."""
    if dim <= preferred:
        return dim
    t = (preferred // align) * align
    while t >= align:
        if dim % t == 0:
            return t
        t -= align
    return dim


def _default_tiles(B, F, D, vmem_limit):
    """Pick (tb, tf) so the double-buffered working sets of both kernels fit."""
    budget = int(vmem_limit * 0.75)

    def need(tb, tf):
        enc = 2 * (tb * D * 2 + D * tf * 2 + tf * 4 + tb * tf * 2)
        dec = 2 * (tb * tf * 2 + tf * D * 2) + tb * D * 4 + D * 4
        return max(enc, dec)

    tb, tf = 512, 4096
    while tf > 512 and need(tb, tf) > budget:
        tf //= 2
    while tb > 128 and need(tb, tf) > budget:
        tb //= 2
    return tb, tf


# ----------------------------- Pallas kernels ----------------------------------

def _encode_kernel(x_ref, w_ref, b_ref, out_ref):
    # x_ref [tb, D] bf16, w_ref [D, tf] bf16, b_ref [1, tf] f32 -> out [tb, tf] bf16
    pre = jnp.dot(x_ref[...], w_ref[...], preferred_element_type=jnp.float32)
    out_ref[...] = jnp.maximum(pre + b_ref[...], 0.0).astype(out_ref.dtype)


def _decode_kernel(tile_ids_ref, counts_ref, thresh_ref,
                   acts_ref, w_ref, b_dec_ref, out_ref):
    # tile_ids_ref [Bt, Ft] i32 / counts_ref [Bt] i32: scalar-prefetch (SMEM).
    # thresh_ref (1,) f32 SMEM; acts_ref [tb, tf] bf16; w_ref [tf, D] bf16;
    # b_dec_ref [1, D] f32; out_ref [tb, D] f32 (resident across the kf axis).
    i = pl.program_id(0)
    kf = pl.program_id(1)

    @pl.when(kf == 0)
    def _():
        out_ref[...] = jnp.broadcast_to(b_dec_ref[...], out_ref.shape)

    @pl.when(kf < counts_ref[i])          # skip compute on inactive / padded steps
    def _():
        a = acts_ref[...]
        keep = a.astype(jnp.float32) > thresh_ref[0]   # strict >; ties fixed in XLA
        a = jnp.where(keep, a, jnp.zeros_like(a))
        out_ref[...] += jnp.dot(a, w_ref[...], preferred_element_type=jnp.float32)


# ----------------------------- pallas_call wrappers ----------------------------

def _pallas_encode(x_bf, w_enc_t, b_enc_eff, tb, tf, vmem_limit):
    B, D = x_bf.shape
    F = w_enc_t.shape[1]
    return pl.pallas_call(
        _encode_kernel,
        out_shape=jax.ShapeDtypeStruct((B, F), jnp.bfloat16),
        grid=(F // tf, B // tb),        # batch innermost -> W_enc tile stays resident
        in_specs=[
            pl.BlockSpec((tb, D), lambda j, i: (i, 0)),
            pl.BlockSpec((D, tf), lambda j, i: (0, j)),
            pl.BlockSpec((1, tf), lambda j, i: (0, j)),
        ],
        out_specs=pl.BlockSpec((tb, tf), lambda j, i: (i, j)),
        compiler_params=pltpu.CompilerParams(
            dimension_semantics=("parallel", "parallel"),
            vmem_limit_bytes=vmem_limit,
        ),
    )(x_bf, w_enc_t, b_enc_eff.reshape(1, F))


def _pallas_decode(tile_ids, counts, thresh, post_relu, w_dec_t, b_dec,
                   tb, tf, vmem_limit):
    B, F = post_relu.shape
    D = w_dec_t.shape[1]
    # TODO(synk): on v7x, sweep pipeline_mode=pl.Buffered(3) on acts/W_dec specs
    # if the profile shows exposed DMA after the traffic reductions.
    return pl.pallas_call(
        _decode_kernel,
        out_shape=jax.ShapeDtypeStruct((B, D), jnp.float32),
        grid_spec=pltpu.PrefetchScalarGridSpec(
            num_scalar_prefetch=2,
            grid=(B // tb, F // tf),
            in_specs=[
                pl.BlockSpec(memory_space=pltpu.MemorySpace.SMEM),            # thresh
                pl.BlockSpec((tb, tf), lambda i, kf, tid, cnt: (i, tid[i, kf])),
                pl.BlockSpec((tf, D), lambda i, kf, tid, cnt: (tid[i, kf], 0)),
                pl.BlockSpec((1, D), lambda i, kf, tid, cnt: (0, 0)),
            ],
            out_specs=pl.BlockSpec((tb, D), lambda i, kf, tid, cnt: (i, 0)),
        ),
        compiler_params=pltpu.CompilerParams(
            dimension_semantics=("parallel", "arbitrary"),
            vmem_limit_bytes=vmem_limit,
        ),
    )(tile_ids, counts, thresh, post_relu, w_dec_t, b_dec.reshape(1, D))


# ----------------------------- forward -----------------------------------------

def batch_topk_sae_forward(x, params, k, output_features=False, tb=None, tf=None):
    """Mirrors BatchTopKSAE.forward (output_features default False)."""
    w_enc_t = params["w_enc_t"]          # [D, F] bf16
    w_dec_t = params["w_dec_t"]          # [F, D] bf16
    b_dec = params["b_dec"]              # [D]    f32
    b_enc_eff = params["b_enc_eff"]      # [F]    f32 (precomputed at init)

    B, D = x.shape
    F = w_enc_t.shape[1]
    if k > F:
        raise ValueError(f"k ({k}) must be <= dict_size ({F}) so k*B <= B*F")

    vmem_limit = _vmem_limit_bytes()
    dtb, dtf = _default_tiles(B, F, D, vmem_limit)
    tb = dtb if tb is None else tb
    tf = dtf if tf is None else tf
    tb = _pick_tile(B, tb, 128 if (B % 128 == 0 and tb >= 128) else 8)
    tf = _pick_tile(F, tf, 256 if (F % 256 == 0 and tf >= 256) else 128)

    # --- encode: relu(x @ W_enc^T + b_enc') in bf16, weight-stationary ---
    x_bf = x.astype(jnp.bfloat16)
    post_relu = _pallas_encode(x_bf, w_enc_t, b_enc_eff, tb, tf, vmem_limit)   # [B,F] bf16

    # --- batch top-k reduced to a scalar threshold (XLA glue) ---
    kb = k * B
    vals, idx = jax.lax.top_k(post_relu.reshape(-1), kb)       # sorted descending
    thresh = vals[kb - 1]                                       # k*B-th largest value
    thresh_f32 = thresh.astype(jnp.float32).reshape(1)

    # --- per-(batch-tile, F-tile) activity -> compacted active-tile-id list ---
    Bt, Ft = B // tb, F // tf
    tile_max = post_relu.reshape(Bt, tb, Ft, tf).max(axis=(1, 3))
    active = tile_max > thresh
    counts = jnp.sum(active, axis=1).astype(jnp.int32)                         # [Bt]
    order = jnp.argsort(jnp.logical_not(active).astype(jnp.int32), axis=1)     # active first
    order = order.astype(jnp.int32)
    last_active = jnp.take_along_axis(order,
                                      jnp.clip(counts - 1, 0, Ft - 1)[:, None], axis=1)
    last_active = jnp.where(counts[:, None] > 0, last_active, 0)
    kf_iota = jnp.arange(Ft, dtype=jnp.int32)[None, :]
    tile_ids = jnp.where(kf_iota < counts[:, None], order, last_active).astype(jnp.int32)

    # --- decode (strict > threshold, inactive F-tiles skipped) ---
    x_hat = _pallas_decode(tile_ids, counts, thresh_f32, post_relu, w_dec_t,
                           b_dec, tb, tf, vmem_limit)                           # [B,D] f32

    # --- exact handling of entries tied with the threshold (tiny gather/scatter).
    # The tied entries are a contiguous suffix of the sorted top-k values; a
    # window of 256 covers any realistic tie count (ties beyond it only matter
    # if >256 activations are bit-equal to the threshold).
    tie_window = min(kb, 256)
    tail_vals = vals[kb - tie_window:]
    tail_idx = idx[kb - tie_window:]
    tie_sel = tail_vals == thresh
    feat = tail_idx % F
    row = tail_idx // F
    tie_w = jnp.where(tie_sel, thresh.astype(jnp.float32), 0.0)
    contrib = tie_w[:, None] * w_dec_t[feat].astype(jnp.float32)                # [T, D]
    x_hat = x_hat.at[row].add(contrib)

    if output_features:
        # TODO(synk): emit `encoded` as a fused second output of the decode kernel.
        post_f32 = post_relu.astype(jnp.float32)
        encoded = jnp.where(post_f32 > thresh_f32[0], post_f32, 0.0)
        encoded = encoded.at[row, feat].add(tie_w)
        return x_hat, encoded
    return x_hat


# ----------------------------- param init --------------------------------------

def init_params(key, activation_dim, dict_size, *, random_biases=False):
    """Mirrors BatchTopKSAE.__init__ shapes/semantics; weights are stored
    pre-transposed in bf16 and the effective encoder bias is precomputed (it
    must be refreshed whenever b_enc / b_dec / W_enc change during training)."""
    D, F = activation_dim, dict_size
    k_w, k_be, k_bd = jax.random.split(key, 3)
    # encoder: nn.Linear(D, F).weight is [F, D].
    w_enc = jax.random.normal(k_w, (F, D), dtype=jnp.float32) * (1.0 / jnp.sqrt(D))
    # decoder.weight = encoder.weight.T -> [D, F], unit-norm columns (dim=0).
    w_dec = w_enc.T
    eps = jnp.finfo(jnp.float32).eps
    w_dec = w_dec / (jnp.linalg.norm(w_dec, axis=0, keepdims=True) + eps)
    if random_biases:
        # Exercise the bias paths numerically (torch zero-inits both).
        b_enc = 0.01 * jax.random.normal(k_be, (F,), dtype=jnp.float32)
        b_dec = 0.1 * jax.random.normal(k_bd, (D,), dtype=jnp.float32)
    else:
        b_enc = jnp.zeros((F,), dtype=jnp.float32)
        b_dec = jnp.zeros((D,), dtype=jnp.float32)
    w_enc_t = w_enc.T.astype(jnp.bfloat16)      # [D, F]
    w_dec_t = w_dec.T.astype(jnp.bfloat16)      # [F, D]
    # relu((x - b_dec) @ W_enc^T + b_enc) == relu(x @ W_enc^T + (b_enc - b_dec @ W_enc^T))
    b_enc_eff = b_enc - jnp.dot(b_dec.astype(jnp.bfloat16), w_enc_t,
                                preferred_element_type=jnp.float32)
    return {"w_enc_t": w_enc_t, "w_dec_t": w_dec_t,
            "b_enc": b_enc, "b_dec": b_dec, "b_enc_eff": b_enc_eff}


# ----------------------------- references (plain JAX) ---------------------------

def reference_encode_xla(x, params):
    """Plain-XLA bf16 post-ReLU activations (same rounding as the kernel path)."""
    x_bf = x.astype(jnp.bfloat16)
    pre = jnp.dot(x_bf, params["w_enc_t"], preferred_element_type=jnp.float32)
    return jnp.maximum(pre + params["b_enc_eff"], 0.0).astype(jnp.bfloat16)


def reference_decode_from_acts(post_relu, params, k):
    """Exact original selection semantics (flat top-k*B + scatter) and decode,
    starting from the given post-ReLU activations."""
    B = post_relu.shape[0]
    flat = post_relu.reshape(-1)
    vals, idxs = jax.lax.top_k(flat, k * B)
    encoded = (jnp.zeros(flat.shape, jnp.float32)
               .at[idxs].set(vals.astype(jnp.float32))
               .reshape(post_relu.shape))
    return encoded @ params["w_dec_t"].astype(jnp.float32) + params["b_dec"]


# ----------------------------- main ---------------------------------------------

if __name__ == "__main__":
    activation_dim = 128    # D
    dict_size = 512         # F
    batch = 32              # B
    k = 4
    tb, tf = 16, 256        # small tiles so the test exercises both (B, F) grids

    key = jax.random.PRNGKey(0)
    k_params, k_x = jax.random.split(key)
    params = init_params(k_params, activation_dim, dict_size, random_biases=True)
    x = jax.random.normal(k_x, (batch, activation_dim), dtype=jnp.float32)

    fwd = jax.jit(functools.partial(batch_topk_sae_forward,
                                    params=params, k=k, tb=tb, tf=tf))
    x_hat = jax.block_until_ready(fwd(x))
    assert x_hat.shape == (batch, activation_dim)
    assert x_hat.dtype == jnp.float32

    # Check 1: encode kernel vs. plain-XLA encode (bf16 rounding tolerated).
    post_kernel = _pallas_encode(x.astype(jnp.bfloat16), params["w_enc_t"],
                                 params["b_enc_eff"], tb, tf, _vmem_limit_bytes())
    post_ref = reference_encode_xla(x, params)
    enc_err = float(jnp.max(jnp.abs(post_kernel.astype(jnp.float32)
                                    - post_ref.astype(jnp.float32))))
    assert enc_err < 5e-2, f"encode mismatch, max abs err = {enc_err}"

    # Check 2: full forward vs. exact top-k + scatter reference built from the
    # kernel's own activations (validates threshold, tie handling, decode tile
    # skipping, accumulation and b_dec).
    x_hat_ref = reference_decode_from_acts(post_kernel, params, k)
    dec_err = float(jnp.max(jnp.abs(x_hat - x_hat_ref)))
    assert jnp.allclose(x_hat, x_hat_ref, atol=2e-3, rtol=2e-3), (
        f"decode mismatch, max abs err = {dec_err}")

    print("KERNEL_OK")
</pallas_src>

<mosaic_0001>
module attributes {stable_mosaic.version = 11 : i64} {
  func.func @_encode_kernel(%arg0: i32, %arg1: i32, %arg2: memref<16x128xbf16, #tpu.memory_space<vmem>>, %arg3: memref<128x256xbf16, #tpu.memory_space<vmem>>, %arg4: memref<1x256xf32, #tpu.memory_space<vmem>>, %arg5: memref<16x256xbf16, #tpu.memory_space<vmem>>) attributes {dimension_semantics = [#tpu.dimension_semantics<parallel>, #tpu.dimension_semantics<parallel>], iteration_bounds = array<i64: 2, 2>, scalar_prefetch = 0 : i64, scratch_operands = 0 : i64, tpu.core_type = #tpu.core_type<tc>, window_params = [{transform_indices = @transform_0, window_bounds = array<i64: 16, 128>}, {transform_indices = @transform_1, window_bounds = array<i64: 128, 256>}, {transform_indices = @transform_2, window_bounds = array<i64: 1, 256>}, {transform_indices = @transform_3, window_bounds = array<i64: 16, 256>}]} {
    %c0 = arith.constant 0 : index
    %c0_0 = arith.constant 0 : index
    %0 = vector.load %arg2[%c0, %c0_0] : memref<16x128xbf16, #tpu.memory_space<vmem>>, vector<16x128xbf16>
    %c0_1 = arith.constant 0 : index
    %c0_2 = arith.constant 0 : index
    %1 = vector.load %arg3[%c0_1, %c0_2] : memref<128x256xbf16, #tpu.memory_space<vmem>>, vector<128x256xbf16>
    %cst = arith.constant dense<0.000000e+00> : vector<16x256xf32>
    %2 = tpu.matmul %0, %1, %cst {dimension_numbers = #tpu.dot_dimension_numbers<[1], [0], [0], [1], [0, 0, 1, 1], [], []>} : vector<16x128xbf16>, vector<128x256xbf16>, vector<16x256xf32> -> vector<16x256xf32>
    %c0_3 = arith.constant 0 : index
    %c0_4 = arith.constant 0 : index
    %3 = vector.load %arg4[%c0_3, %c0_4] : memref<1x256xf32, #tpu.memory_space<vmem>>, vector<1x256xf32>
    %4 = vector.broadcast %3 : vector<1x256xf32> to vector<16x256xf32>
    %5 = arith.addf %2, %4 : vector<16x256xf32>
    %cst_5 = arith.constant 0.000000e+00 : f32
    %6 = vector.broadcast %cst_5 : f32 to vector<16x256xf32>
    %7 = arith.maximumf %5, %6 : vector<16x256xf32>
    %8 = arith.truncf %7 : vector<16x256xf32> to vector<16x256xbf16>
    %c0_6 = arith.constant 0 : index
    %c0_7 = arith.constant 0 : index
    %9 = vector.load %arg5[%c0_6, %c0_7] : memref<16x256xbf16, #tpu.memory_space<vmem>>, vector<16x256xbf16>
    tpu.vector_store %arg5[%c0_6, %c0_7], %8 {strides = array<i32>} : memref<16x256xbf16, #tpu.memory_space<vmem>>, vector<16x256xbf16>,
    return
  }
  func.func @transform_0(%arg0: i32, %arg1: i32) -> (i32, i32) {
    %c0_i32 = arith.constant 0 : i32
    %c0_i32_0 = arith.constant 0 : i32
    return %arg1, %c0_i32 : i32, i32
  }
  func.func @transform_1(%arg0: i32, %arg1: i32) -> (i32, i32) {
    %c0_i32 = arith.constant 0 : i32
    %c0_i32_0 = arith.constant 0 : i32
    return %c0_i32, %arg0 : i32, i32
  }
  func.func @transform_2(%arg0: i32, %arg1: i32) -> (i32, i32) {
    %c0_i32 = arith.constant 0 : i32
    %c0_i32_0 = arith.constant 0 : i32
    return %c0_i32, %arg0 : i32, i32
  }
  func.func @transform_3(%arg0: i32, %arg1: i32) -> (i32, i32) {
    %c0_i32 = arith.constant 0 : i32
    return %arg1, %arg0 : i32, i32
  }
}

module attributes {stable_mosaic.version = 11 : i64} {
  func.func @_decode_kernel(%arg0: i32, %arg1: i32, %arg2: memref<2x2xi32, #tpu.memory_space<smem>>, %arg3: memref<2xi32, #tpu.memory_space<smem>>, %arg4: memref<1xf32, #tpu.memory_space<smem>>, %arg5: memref<16x256xbf16, #tpu.memory_space<vmem>>, %arg6: memref<256x128xbf16, #tpu.memory_space<vmem>>, %arg7: memref<1x128xf32, #tpu.memory_space<vmem>>, %arg8: memref<16x128xf32, #tpu.memory_space<vmem>>) attributes {dimension_semantics = [#tpu.dimension_semantics<parallel>, #tpu.dimension_semantics<arbitrary>], iteration_bounds = array<i64: 2, 2>, scalar_prefetch = 2 : i64, scratch_operands = 0 : i64, tpu.core_type = #tpu.core_type<tc>, window_params = [{transform_indices = @transform_0, window_bounds = array<i64: 1>}, {transform_indices = @transform_1, window_bounds = array<i64: 16, 256>}, {transform_indices = @transform_2, window_bounds = array<i64: 256, 128>}, {pipeline_mode = #tpu.pipeline_mode<synchronous>, transform_indices = @transform_3, window_bounds = array<i64: 1, 128>}, {transform_indices = @transform_4, window_bounds = array<i64: 16, 128>}]} {
    %c0_i32 = arith.constant 0 : i32
    %0 = arith.cmpi eq, %arg1, %c0_i32 : i32
    %1 = arith.extui %0 : i1 to i32
    %c0_i32_0 = arith.constant 0 : i32
    %2 = arith.cmpi ne, %1, %c0_i32_0 : i32
    scf.if %2 {
      %c0 = arith.constant 0 : index
      %c0_2 = arith.constant 0 : index
      %8 = vector.load %arg7[%c0, %c0_2] : memref<1x128xf32, #tpu.memory_space<vmem>>, vector<1x128xf32>
      %9 = vector.shape_cast %8 : vector<1x128xf32> to vector<1x128xf32>
      %10 = vector.broadcast %9 : vector<1x128xf32> to vector<16x128xf32>
      %c0_3 = arith.constant 0 : index
      %c0_4 = arith.constant 0 : index
      %11 = vector.load %arg8[%c0_3, %c0_4] : memref<16x128xf32, #tpu.memory_space<vmem>>, vector<16x128xf32>
      tpu.vector_store %arg8[%c0_3, %c0_4], %10 {strides = array<i32>} : memref<16x128xf32, #tpu.memory_space<vmem>>, vector<16x128xf32>,
    } else {
    }
    %3 = arith.index_cast %arg0 : i32 to index
    %4 = memref.load %arg3[%3] : memref<2xi32, #tpu.memory_space<smem>>
    %5 = arith.cmpi slt, %arg1, %4 : i32
    %6 = arith.extui %5 : i1 to i32
    %c0_i32_1 = arith.constant 0 : i32
    %7 = arith.cmpi ne, %6, %c0_i32_1 : i32
    scf.if %7 {
      %c0 = arith.constant 0 : index
      %c0_2 = arith.constant 0 : index
      %8 = vector.load %arg5[%c0, %c0_2] : memref<16x256xbf16, #tpu.memory_space<vmem>>, vector<16x256xbf16>
      %9 = arith.extf %8 : vector<16x256xbf16> to vector<16x256xf32>
      %c0_3 = arith.constant 0 : index
      %10 = memref.load %arg4[%c0_3] : memref<1xf32, #tpu.memory_space<smem>>
      %11 = vector.broadcast %10 : f32 to vector<16x256xf32>
      %12 = arith.cmpf ogt, %9, %11 : vector<16x256xf32>
      %cst = arith.constant 0.000000e+00 : bf16
      %13 = vector.broadcast %cst : bf16 to vector<16x256xbf16>
      %14 = arith.select %12, %8, %13 : vector<16x256xi1>, vector<16x256xbf16>
      %c0_4 = arith.constant 0 : index
      %c0_5 = arith.constant 0 : index
      %15 = vector.load %arg8[%c0_4, %c0_5] : memref<16x128xf32, #tpu.memory_space<vmem>>, vector<16x128xf32>
      %c0_6 = arith.constant 0 : index
      %c0_7 = arith.constant 0 : index
      %16 = vector.load %arg6[%c0_6, %c0_7] : memref<256x128xbf16, #tpu.memory_space<vmem>>, vector<256x128xbf16>
      %cst_8 = arith.constant dense<0.000000e+00> : vector<16x128xf32>
      %17 = tpu.matmul %14, %16, %cst_8 {dimension_numbers = #tpu.dot_dimension_numbers<[1], [0], [0], [1], [0, 0, 1, 1], [], []>} : vector<16x256xbf16>, vector<256x128xbf16>, vector<16x128xf32> -> vector<16x128xf32>
      %18 = arith.addf %15, %17 : vector<16x128xf32>
      %c0_9 = arith.constant 0 : index
      %c0_10 = arith.constant 0 : index
      %19 = vector.load %arg8[%c0_9, %c0_10] : memref<16x128xf32, #tpu.memory_space<vmem>>, vector<16x128xf32>
      tpu.vector_store %arg8[%c0_9, %c0_10], %18 {strides = array<i32>} : memref<16x128xf32, #tpu.memory_space<vmem>>, vector<16x128xf32>,
    } else {
    }
    return
  }
  func.func @transform_0(%arg0: i32, %arg1: i32, %arg2: memref<2x2xi32, #tpu.memory_space<smem>>, %arg3: memref<2xi32, #tpu.memory_space<smem>>) -> i32 {
    %c0_i32 = arith.constant 0 : i32
    %c0_i32_0 = arith.constant 0 : i32
    return %c0_i32 : i32
  }
  func.func @transform_1(%arg0: i32, %arg1: i32, %arg2: memref<2x2xi32, #tpu.memory_space<smem>>, %arg3: memref<2xi32, #tpu.memory_space<smem>>) -> (i32, i32) {
    %0 = arith.index_cast %arg0 : i32 to index
    %1 = arith.index_cast %arg1 : i32 to index
    %2 = memref.load %arg2[%0, %1] : memref<2x2xi32, #tpu.memory_space<smem>>
    %c0_i32 = arith.constant 0 : i32
    return %arg0, %2 : i32, i32
  }
  func.func @transform_2(%arg0: i32, %arg1: i32, %arg2: memref<2x2xi32, #tpu.memory_space<smem>>, %arg3: memref<2xi32, #tpu.memory_space<smem>>) -> (i32, i32) {
    %0 = arith.index_cast %arg0 : i32 to index
    %1 = arith.index_cast %arg1 : i32 to index
    %2 = memref.load %arg2[%0, %1] : memref<2x2xi32, #tpu.memory_space<smem>>
    %c0_i32 = arith.constant 0 : i32
    %c0_i32_0 = arith.constant 0 : i32
    return %2, %c0_i32 : i32, i32
  }
  func.func @transform_3(%arg0: i32, %arg1: i32, %arg2: memref<2x2xi32, #tpu.memory_space<smem>>, %arg3: memref<2xi32, #tpu.memory_space<smem>>) -> (i32, i32) {
    %c0_i32 = arith.constant 0 : i32
    %c0_i32_0 = arith.constant 0 : i32
    %c0_i32_1 = arith.constant 0 : i32
    return %c0_i32, %c0_i32_0 : i32, i32
  }
  func.func @transform_4(%arg0: i32, %arg1: i32, %arg2: memref<2x2xi32, #tpu.memory_space<smem>>, %arg3: memref<2xi32, #tpu.memory_space<smem>>) -> (i32, i32) {
    %c0_i32 = arith.constant 0 : i32
    %c0_i32_0 = arith.constant 0 : i32
    return %arg0, %c0_i32 : i32, i32
  }
}

</mosaic_0001>

<bundles_post_ra>
// kernel: batch_topk_sae_forward.2
= control target key start
LH: loop header
LB: loop body
LE: loop exit
PB: predicated region body
PF: predicated region fallthrough
CT: control target
= control target key end

     0   :  { %8 = vsyncpa [#allocation3], 0  ;;  %s1052_s0 = inlined_call_operand.vmem [shape: bf16[32,128], index: 0, kind: input, shape index: {}]   ;;  %s1053_s1 = inlined_call_operand.hbm [shape: bf16[128,512], index: 1, kind: input, shape index: {}]   ;;  %s1054_s2 = inlined_call_operand.vmem [shape: f32[1,512], index: 2, kind: input, shape index: {}]   ;;  %s1055_s3 = inlined_call_operand.vmem [shape: bf16[32,512], index: 3, kind: output, shape index: {}]  }
   0x1   :  { %10 = vsyncpa [#allocation3 + $0x1], 0  ;;  %s872_s12 = smov 0   ;;  %s874_s13 = smov 0  }
   0x2   :  { %s876_s14 = smov 0   ;;  %s878_s15 = smov 0  }
   0x3   :  { %s880_s16 = smov 0   ;;  %s882_s17 = smov 0  }
   0x4   :  { %s884_s18 = smov 0   ;;  %s886_s19 = smov 0  }
   0x5   :  { %s888_s20 = smov 0   ;;  %s890_s21 = smov 0  }
   0x6 LB: > { %s538_s22 = sadd.s32 4294967295, %s847_s21   ;;  %s25_s23 = sadd.s32 1, %s839_s19  ;;  %s847_s21 = sphi %s890_s21, %s16_s21   ;;  %s843_s20 = sphi %s888_s20, %s1073_s20   ;;  %s839_s19 = sphi %s886_s19, %s1072_s19   ;;  %s835_s18 = sphi %s884_s18, %s1071_s18   ;;  %s831_s17 = sphi %s882_s17, %s1070_s17   ;;  %s827_s16 = sphi %s880_s16, %s1069_s16   ;;  %s823_s15 = sphi %s878_s15, %s1068_s15   ;;  %s819_s14 = sphi %s876_s14, %s1067_s14   ;;  %s815_s13 = sphi %s874_s13, %s1066_s13   ;;  %s811_s12 = sphi %s872_s12, %s1065_s12  }
   0x7   : > { %p26_p0 = scmp.ge.s32.totalorder %s25_s23, 2  ;;  %s28_s24 = sadd.s32 1, %s843_s20 }
   0x8   : > { %s61_s25 = sadd.s32 1, %s827_s16  ;;  %p68_p1 = scmp.ne.s32.totalorder %s827_s16, %s823_s15 }
   0x9   : > { %s1075_s23 = smov (%p26_p0, %s25_s23), 0  ;;  %s1077_s24 = smov (!%p26_p0, %s28_s24), %s843_s20 }
   0xa   : > { %1058 = sst [smem:[#allocation6_spill]] %s1075_s23  ;;  %p69_p2 = scmp.eq.s32.totalorder %s847_s21, 0 }
   0xb   : > { %p74_p3 = scmp.ne.s32.totalorder %s823_s15, %s819_s14  ;;  %p30_p4 = scmp.ge.s32.totalorder %s1077_s24, 2 }
   0xc   : > { %p75_p5 = scmp.eq.s32.totalorder %s538_s22, 0  ;;  %p931_p6 = por %p69_p2, %p68_p1 }
   0xd   : > { %s110_s27 = ssub.s32 %s839_s19, %s1075_s23  ;;  %s1079_s24 = smov (%p30_p4, %s1077_s24), 0 }
   0xe   : > { %1060 = sst [smem:[#allocation7_spill]] %s1079_s24  ;;  %p939_p7 = por %p75_p5, %p74_p3 }
   0xf   : > { %s115_s29 = sadd.s32 1, %s815_s13  ;;  %s58_s30 = ssub.s32 %s843_s20, %s1079_s24 }
  0x10   : > { %p125_p8 = scmp.ne.s32.totalorder %s815_s13, %s811_s12  ;;  %p59_p9 = scmp.eq.s32.totalorder %s58_s30, 0 }
  0x11   : > { %s112_s4 = sor.u32 %s110_s27, %s58_s30  ;;  %p126_p11 = scmp.eq.s32.totalorder %s538_s22, 3 }
  0x12   : > { %p113_p10 = scmp.eq.s32.totalorder %s112_s4, 0  ;;  %p651_p13 = scmp.lt.s32.totalorder %s847_s21, 4 }
  0x13   : > { %s949_s5 = scalar_select %p59_p9, %s827_s16, %s61_s25  }
  0x14   : > { %s952_s6 = scalar_select %p113_p10, %s815_s13, %s115_s29  }
  0x15   : > { %p954_p12 = por %p126_p11, %p125_p8  ;;  %s161_s8 = sand.u32 1, %s827_s16  }
  0x16   : > { %s542_s9 = sshll.u32 %s161_s8, 7  ;;  %s626_s10 = sshll.u32 %s843_s20, 3 }
  0x17   : > { %s170_s27 = scalar_lea.hbm %s1053_s1, %s626_s10  ;;  %s165_s30 = scalar_lea.vmem [#allocation2], %s542_s9 }
  0x18   : > { %s173_s22 = sshll.u32 %s165_s30, 4  ;;  %s171_s25 = sshll.u32 %s170_s27, 4  ;;  %s174_s22 = int_to_ptr.vmem [resolvable:$true] %s173_s22  ;;  %s172_s25 = int_to_ptr.hbm [resolvable:$true] %s171_s25 }
  0x19   : > { %p648_p0 = pnand %p651_p13, %p931_p6  ;;  %s162_s29 = scalar_lea.sflag [#allocation3], %s161_s8 }
  0x1a   : > { %s849_s4 = smov 256   ;;  %s850_s24 = smov 128  }
  0x1b   : > { %s851_s23 = smov 8   ;;  %p545_p1 = scmp.ge.s32.totalorder %s847_s21, 1 }
  0x1c   : > { %650 = dma.hbm_to_vmem [thread:$0]  (!%p648_p0), %s172_s25, 2048, %s174_s22, %s162_s29, %s849_s4, %s850_s24, %s851_s23  }
  0x1d   : > { %p189_p2 = scmp.lt.s32.totalorder %s847_s21, 5 }
  0x1f   : > { %p190_p3 = pnand %p545_p1, %p189_p2 }
  0x20   : > { %s195_s11 = sand.u32 (!%p190_p3), 1, %s823_s15  }
  0x21   : > { %193 = sbr.rel (%p190_p3) target bundleno = 223 (0xdf), region = 32  ;;  %s546_s10 = sshll.u32 (!%p190_p3), %s195_s11, 7 }
  0x22   : > { %s196_s9 = scalar_lea.sflag (!%p190_p3), [#allocation3], %s195_s11  ;;  %s969_s14 = scalar_lea.vmem (!%p190_p3), [#allocation2], %s546_s10 }
  0x26   : > { %806 = dma.done.wait (%p939_p7), %s196_s9, 2048  }
  0x27   : > { %808 = vsyncadd (%p939_p7), %s196_s9, 4294965248  ;;  %v613_v0 = vld [vmem:[%s969_s14 + $0x70] sm:$0xf]  ;;  %v643_v1 = vld [vmem:[%s969_s14 + $0x74] sm:$0xf0]  ;;  %s548_s23 = sshll.u32 %s831_s17, 1 }
  0x28   : > { %v642_v2 = vld [vmem:[%s969_s14 + $0x74] sm:$0xf]  ;;  %v614_v3 = vor.u32 %v643_v1, %v613_v0  ;;  %v615_v4 = vld [vmem:[%s969_s14 + $0x78] sm:$0xf0]  ;;  %v605_v5 = vld [vmem:[%s969_s14 + $0x60] sm:$0xf] }
  0x29   : > { %v641_v6 = vld [vmem:[%s969_s14 + $0x64] sm:$0xf0]  ;;  %v618_v7 = vor.u32 %v642_v2, %v615_v4  ;;  %v640_v8 = vld [vmem:[%s969_s14 + $0x64] sm:$0xf]  ;;  %v607_v9 = vld [vmem:[%s969_s14 + $0x68] sm:$0xf0] }
  0x2a   : > { %355 = vmatpush.bf16.msra.mxu0 %v614_v3  ;;  %v606_v10 = vor.u32 %v641_v6, %v605_v5  ;;  %v610_v11 = vor.u32 %v640_v8, %v607_v9  ;;  %v597_v12 = vld [vmem:[%s969_s14 + $0x50] sm:$0xf]  ;;  %v639_v13 = vld [vmem:[%s969_s14 + $0x54] sm:$0xf0]  ;;  %v638_v14 = vld [vmem:[%s969_s14 + $0x54] sm:$0xf] }
  0x2b   : > { %369 = vmatpush.bf16.msra.mxu1 %v618_v7  ;;  %v599_v15 = vld [vmem:[%s969_s14 + $0x58] sm:$0xf0]  ;;  %v598_v16 = vor.u32 %v639_v13, %v597_v12  ;;  %v589_v18 = vld [vmem:[%s969_s14 + $0x40] sm:$0xf]  ;;  %v637_v19 = vld [vmem:[%s969_s14 + $0x44] sm:$0xf0] }
  0x2c   : > { %v602_v17 = vor.u32 %v638_v14, %v599_v15  ;;  %v636_v20 = vld [vmem:[%s969_s14 + $0x44] sm:$0xf]  ;;  %v591_v21 = vld [vmem:[%s969_s14 + $0x48] sm:$0xf0]  ;;  %v590_v22 = vor.u32 %v637_v19, %v589_v18  ;;  %v581_v24 = vld [vmem:[%s969_s14 + $0x30] sm:$0xf] }
  0x2d   : > { %v594_v23 = vor.u32 %v636_v20, %v591_v21  ;;  %v635_v25 = vld [vmem:[%s969_s14 + $0x34] sm:$0xf0]  ;;  %v634_v26 = vld [vmem:[%s969_s14 + $0x34] sm:$0xf]  ;;  %v583_v27 = vld [vmem:[%s969_s14 + $0x38] sm:$0xf0] }
  0x2e   : > { %356 = vmatpush.bf16.msra.mxu0 %v606_v10  ;;  %v582_v28 = vor.u32 %v635_v25, %v581_v24  ;;  %v586_v29 = vor.u32 %v634_v26, %v583_v27  ;;  %v573_v30 = vld [vmem:[%s969_s14 + $0x20] sm:$0xf]  ;;  %v633_v31 = vld [vmem:[%s969_s14 + $0x24] sm:$0xf0]  ;;  %p232_p4 = scmp.lt.s32.totalorder %s548_s23, 3  ;;  %s550_s27 = sshll.u32 %s835_s18, 1 }
  0x2f   : > { %370 = vmatpush.bf16.msra.mxu1 %v610_v11  ;;  %v632_v32 = vld [vmem:[%s969_s14 + $0x24] sm:$0xf]  ;;  %v575_v33 = vld [vmem:[%s969_s14 + $0x28] sm:$0xf0]  ;;  %v574_v34 = vor.u32 %v633_v31, %v573_v30  ;;  %v565_v36 = vld [vmem:[%s969_s14 + $0x10] sm:$0xf] }
  0x30   : > { %v578_v35 = vor.u32 %v632_v32, %v575_v33  ;;  %v631_v37 = vld [vmem:[%s969_s14 + $0x14] sm:$0xf0]  ;;  %s1081_s23 = smov (!%p232_p4, %s548_s23), 3  ;;  %v630_v38 = vld [vmem:[%s969_s14 + $0x14] sm:$0xf]  ;;  %p239_p5 = scmp.lt.s32.totalorder %s550_s27, 3 }
  0x31   : > { %v567_v39 = vld [vmem:[%s969_s14 + $0x18] sm:$0xf0]  ;;  %v566_v40 = vor.u32 %v631_v37, %v565_v36  ;;  %v557_v42 = vld [vmem:[%s969_s14] sm:$0xf]  ;;  %v629_v43 = vld [vmem:[%s969_s14 + $0x4] sm:$0xf0] }
  0x32   : > { %357 = vmatpush.bf16.msra.mxu0 %v598_v16  ;;  %v570_v41 = vor.u32 %v630_v38, %v567_v39  ;;  %s549_s24 = sshll.u32 %s1081_s23, 2  ;;  %v628_v44 = vld [vmem:[%s969_s14 + $0x4] sm:$0xf]  ;;  %v559_v45 = vld [vmem:[%s969_s14 + $0x8] sm:$0xf0]  ;;  %v558_v46 = vor.u32 %v629_v43, %v557_v42  ;;  %s228_s4 = sand.u32 1, %s811_s12  }
  0x33   : > { %371 = vmatpush.bf16.msra.mxu1 %v602_v17  ;;  %s235_s8 = scalar_lea.vmem %s1052_s0, %s549_s24  ;;  %v562_v47 = vor.u32 %v628_v44, %v559_v45  ;;  %s547_s11 = sshll.u32 %s228_s4, 4 }
  0x34   : > { %v627_v48 = vld [vmem:[%s235_s8] sm:$0xff]  ;;  %s240_s30 = scalar_select %p239_p5, %s550_s27, 3 }
  0x35   : > { %s230_s10 = scalar_lea.vmem [#allocation4], %s547_s11  ;;  %s644_s12 = sshll.u32 (%p954_p12), %s831_s17, 3 }
  0x36   : > { %358 = vmatpush.bf16.msra.mxu0 %v590_v22  ;;  %s241_s29 = scalar_lea.vmem %s1054_s2, %s240_s30  ;;  %s401_s18 = sadd.s32 (%p954_p12), %s644_s12, %s550_s27 }
  0x37   : > { %372 = vmatpush.bf16.msra.mxu1 %v594_v23  ;;  %v263_v49 = vld [vmem:[%s241_s29] sm:$0x3]  ;;  %s623_s9 = sshll.u32 (%p954_p12), %s401_s18, 2 }
  0x38   : > { %v265_v50 = vperm.slane %v263_v49, 0  ;;  %v266_v51 = vperm.slane %v263_v49, 1  ;;  %s403_s24 = scalar_lea.vmem (%p954_p12), %s1055_s3, %s623_s9 }
  0x3a   : > { %359 = vmatpush.bf16.msra.mxu0 %v582_v28 }
  0x3b   : > { %373 = vmatpush.bf16.msra.mxu1 %v586_v29 }
  0x3e   : > { %360 = vmatpush.bf16.msra.mxu0 %v574_v34 }
  0x3f   : > { %374 = vmatpush.bf16.msra.mxu1 %v578_v35 }
  0x42   : > { %361 = vmatpush.bf16.msra.mxu0 %v566_v40 }
  0x43   : > { %375 = vmatpush.bf16.msra.mxu1 %v570_v41 }
  0x46   : > { %362 = vmatpush.bf16.msra.mxu0 %v558_v46 }
  0x47   : > { %376 = vmatpush.bf16.msra.mxu1 %v562_v47 }
  0x49   : > { %363 = vmatmul.bf16.vlgmr.msra.gmra.mxu0 %v627_v48 }
  0x4a   : > { %377 = vmatmul.bf16.vlgmr.msra.gmra.mxu1 %v627_v48 }
  0xc6   : > { %v364_v52 = vpop.f32.mrf.mxu0 }
  0xc7   : > { %v365_v53 = vadd.f32 %v364_v52, %v265_v50  ;;  %v378_v54 = vpop.f32.mrf.mxu1 }
  0xc8   : > { %v379_v55 = vadd.f32 %v378_v54, %v266_v51 }
  0xc9   : > { %v383_v56 = vmax.f32 %v365_v53, 0.0 }
  0xca   : > { %v384_v57 = vmax.f32 %v379_v55, 0.0 }
  0xcc   : > { %v387_v58 = vpack.c.bf16 %v384_v57, %v383_v56 }
  0xce   : > { %389 = vst [vmem:[%s230_s10] sm:$0xff] %v387_v58  ;;  %v366_v59 = vpop.f32.mrf.mxu0 }
  0xcf   : > { %v367_v60 = vadd.f32 %v366_v59, %v265_v50  ;;  %v380_v61 = vpop.f32.mrf.mxu1 }
  0xd0   : > { %v381_v62 = vadd.f32 %v380_v61, %v266_v51 }
  0xd1   : > { %v385_v63 = vmax.f32 %v367_v60, 0.0 }
  0xd2   : > { %v386_v0 = vmax.f32 %v381_v62, 0.0  ;;  %397 = sbr.rel (!%p954_p12) target bundleno = 223 (0xdf), region = 40 }
  0xd4   : > { %v388_v1 = vpack.c.bf16 %v386_v0, %v385_v63 }
  0xd5   : > { %v434_v2 = vld [vmem:[%s230_s10] sm:$0xff] (%p954_p12) }
  0xd6   : > { %390 = vst [vmem:[%s230_s10 + $0x8] sm:$0xff] %v388_v1 }
  0xd7   : > { %435 = vst [vmem:[%s403_s24] sm:$0xff] %v434_v2 }
  0xdd   : > { %v436_v3 = vld [vmem:[%s230_s10 + $0x8] sm:$0xff] }
  0xde   : > { %437 = vst [vmem:[%s403_s24 + $0x10] sm:$0xff] %v436_v3 }
  0xdf PF: > { %s16_s21 = sadd.s32 1, %s847_s21   ;;  %s1063_s7 = sld [smem:[#allocation6_spill]] }
  0xe0   : > { %p13_p6 = scmp.ge.s32.totalorder %s16_s21, 6   ;;  %s1064_s26 = sld [smem:[#allocation7_spill]] }
  0xe1   : > { %s1065_s12 = smov %s815_s13  ;;  %s1066_s13 = smov %s952_s6 }
  0xe2   : > { %s1067_s14 = smov %s823_s15  ;;  %s1068_s15 = smov %s827_s16 }
  0xe3   : > { %s1069_s16 = smov %s949_s5  ;;  %s1070_s17 = smov %s839_s19 }
  0xe4   : > { %s1071_s18 = smov %s843_s20  ;;  %15 = sbr.rel (!%p13_p6) target bundleno = 6 (0x6), region = 116 }
  0xe5   : > { %s1072_s19 = smov %s1063_s7 }
  0xe6   : > { %s1073_s20 = smov %s1064_s26 }
  0xe9   :  { %453 = vsyncpa [#allocation3], 1 }
  0xea   :  { %455 = vsyncpa [#allocation3 + $0x1], 1 }

// kernel: batch_topk_sae_forward.3
= control target key start
LH: loop header
LB: loop body
LE: loop exit
PB: predicated region body
PF: predicated region fallthrough
CT: control target
= control target key end

     0   :  { %s1035_s27 = smov [#allocation3]   ;;  %s1036_s28 = smov [#allocation4]   ;;  %s1285_s0 = inlined_call_operand.vmem [shape: s32[2,2], index: 0, kind: input, shape index: {}]   ;;  %s1286_s3 = inlined_call_operand.vmem [shape: bf16[32,512], index: 3, kind: input, shape index: {}]   ;;  %s1287_s4 = inlined_call_operand.vmem [shape: bf16[512,128], index: 4, kind: input, shape index: {}]   ;;  %s1288_s5 = inlined_call_operand.vmem [shape: f32[1,128], index: 5, kind: input, shape index: {}]   ;;  %s1289_s6 = inlined_call_operand.hbm [shape: f32[32,128], index: 6, kind: output, shape index: {}]   ;;  %s1290_s1 = inlined_call_operand.vmem [shape: s32[2], index: 1, kind: input, shape index: {}]   ;;  %s1291_s2 = inlined_call_operand.<no memory space> [shape: f32[1], index: 2, kind: input, shape index: {}]  }
   0x1   :  { %1296 = sst [smem:[#allocation14_spill]] %s1286_s3  ;;  %s12_s23 = sshll.u32 %s1285_s0, 4  ;;  %s13_s23 = int_to_ptr.vmem [resolvable:$true] %s12_s23 }
   0x2   :  { %s17_s26 = sshll.u32 %s1290_s1, 4  ;;  %21 = sst [smem:[#allocation5]] %s1291_s2  ;;  %s18_s26 = int_to_ptr.vmem [resolvable:$true] %s17_s26 }
   0x3   :  { %15 = dma.vmem_to_smem %s13_s23, 32, %s1035_s27, [#allocation2] }
   0x4   :  { %20 = dma.vmem_to_smem %s18_s26, 16, %s1036_s28, [#allocation2] }
   0x5   :  { %989 = dma.done.wait [#allocation2], 48 }
   0x6   :  { %990 = vsyncadd [#allocation2], 4294967248 }
   0x7   :  { %24 = sfence }
   0x8   :  { %25 = vsyncpa [#allocation8], 0 }
   0x9   :  { %27 = vsyncpa [#allocation8 + $0x1], 0  ;;  %s1083_s0 = smov 0   ;;  %s1085_s7 = smov 0  }
   0xa   :  { %s1087_s1 = smov 0   ;;  %s1089_s8 = smov 0  }
   0xb   :  { %s1091_s9 = smov 0   ;;  %s1093_s10 = smov 0  }
   0xc   :  { %s1095_s11 = smov 0   ;;  %s1097_s2 = smov 0  }
   0xd   :  { %s1099_s12 = smov 0   ;;  %s1101_s13 = smov 0  }
   0xe LB: > { %1297 = sst [smem:[#allocation11_spill]] %s1029_s12  ;;  %s696_s14 = sadd.s32 4294967295, %s1033_s13   ;;  %s1033_s13 = sphi %s1101_s13, %s33_s13   ;;  %s1029_s12 = sphi %s1099_s12, %s1307_s12   ;;  %s1025_s2 = sphi %s1097_s2, %s1314_s2   ;;  %s1021_s11 = sphi %s1095_s11, %s1305_s11   ;;  %s1017_s10 = sphi %s1093_s10, %s1313_s10   ;;  %s1013_s9 = sphi %s1091_s9, %s1312_s9   ;;  %s1009_s8 = sphi %s1089_s8, %s1311_s8   ;;  %s1005_s1 = sphi %s1087_s1, %s1310_s1   ;;  %s1001_s7 = sphi %s1085_s7, %s1309_s7   ;;  %s997_s0 = sphi %s1083_s0, %s1308_s0  }
   0xf   : > { %s42_s15 = sadd.s32 1, %s1025_s2  ;;  %s45_s16 = sadd.s32 1, %s1029_s12 }
  0x10   : > { %p43_p0 = scmp.ge.s32.totalorder %s42_s15, 2  ;;  %s70_s17 = sshra.s32 %s1025_s2, 7 }
  0x11   : > { %s72_s18 = sadd.s32 %s1029_s12, %s70_s17  ;;  %s75_s19 = sand.u32 127, %s1025_s2 }
  0x12   : > { %s1316_s15 = smov (%p43_p0, %s42_s15), 0  ;;  %s1318_s16 = smov (!%p43_p0, %s45_s16), %s1029_s12 }
  0x13   : > { %1298 = sst [smem:[#allocation12_spill]] %s1316_s15  ;;  %s697_s20 = sadd.s32 4294967294, %s1033_s13  }
  0x14   : > { %s698_s21 = sshll.u32 %s72_s18, 7  ;;  %p47_p1 = scmp.ge.s32.totalorder %s1318_s16, 2 }
  0x15   : > { %s76_s22 = sadd.s32 %s698_s21, %s75_s19  ;;  %s78_s24 = sshra.s32 %s1316_s15, 7 }
  0x16   : > { %s77_s23 = sld [smem:[#allocation3 + %s76_s22]]  ;;  %s1320_s16 = smov (%p47_p1, %s1318_s16), 0 }
  0x17   : > { %1299 = sst [smem:[#allocation13_spill]] %s1320_s16  ;;  %s83_s25 = sand.u32 127, %s1316_s15 }
  0x18   : > { %p98_p2 = scmp.ne.s32.totalorder %s1013_s9, %s1009_s8  ;;  %s80_s26 = sadd.s32 %s78_s24, %s1320_s16 }
  0x19   : > { %s86_s27 = ssub.s32 %s1029_s12, %s1320_s16  ;;  %s699_s28 = sshll.u32 %s80_s26, 7 }
  0x1a   : > { %p99_p3 = scmp.eq.s32.totalorder %s1033_s13, 0  ;;  %s84_s29 = sadd.s32 %s699_s28, %s83_s25 }
  0x1b   : > { %p178_p4 = scmp.eq.s32.totalorder %s86_s27, 0  ;;  %s85_s30 = sld [smem:[#allocation3 + %s84_s29]] }
  0x1c   : > { %p1153_p5 = por %p99_p3, %p98_p2  ;;  %s180_s18 = sadd.s32 1, %s1005_s1 }
  0x1d   : > { %p190_p6 = scmp.ne.s32.totalorder %s1005_s1, %s1001_s7  ;;  %p191_p7 = scmp.eq.s32.totalorder %s696_s14, 3 }
  0x1e   : > { %s1161_s19 = scalar_select %p178_p4, %s1005_s1, %s180_s18  }
  0x1f   : > { %p196_p8 = scmp.ne.s32.totalorder %s1001_s7, %s997_s0  ;;  %p197_p9 = scmp.eq.s32.totalorder %s697_s20, 3 }
  0x20   : > { %p1167_p10 = por %p191_p7, %p190_p6  ;;  %s91_s28 = sadd.s32 1, %s1013_s9 }
  0x21   : > { %s87_s24 = ssub.s32 %s77_s23, %s85_s30  ;;  %p1171_p11 = por %p197_p9, %p196_p8 }
  0x22   : > { %s88_s26 = sor.u32 %s87_s24, %s86_s27  ;;  %p703_p13 = scmp.ge.s32.totalorder %s1033_s13, 4 }
  0x23   : > { %p89_p12 = scmp.eq.s32.totalorder %s88_s26, 0 }
  0x24   : > { %219 = sbr.rel (%p703_p13) target bundleno = 54 (0x36), region = 24 }
  0x25   : > { %s1177_s29 = scalar_select %p89_p12, %s1013_s9, %s91_s28  }
  0x29   : > { %222 = sbr.rel (!%p1153_p5) target bundleno = 54 (0x36), region = 28  ;;  %s234_s14 = sld [smem:[#allocation3 + %s76_s22]] (%p1153_p5) }
  0x2a   : > { %s224_s20 = sand.u32 (%p1153_p5), 1, %s1013_s9   ;;  %s787_s23 = sshll.u32 (%p1153_p5), %s1029_s12, 3 }
  0x2b   : > { %s704_s30 = sshll.u32 (%p1153_p5), %s224_s20, 4  ;;  %s1303_s3 = sld [smem:[#allocation14_spill]] (%p1153_p5) }
  0x2c   : > { %s226_s28 = scalar_lea.vmem (%p1153_p5), [#allocation6], %s704_s30 }
  0x2f   : > { %s707_s18 = sshll.u32 %s234_s14, 1 }
  0x30   : > { %s238_s16 = sadd.s32 %s787_s23, %s707_s18 }
  0x31   : > { %s709_s15 = sshll.u32 %s238_s16, 2 }
  0x32   : > { %s240_s26 = scalar_lea.vmem %s1303_s3, %s709_s15 }
  0x33   : > { %v271_v0 = vld [vmem:[%s240_s26] sm:$0xff]  ;;  %v273_v1 = vld [vmem:[%s240_s26 + $0x10] sm:$0xff] }
  0x34   : > { %272 = vst [vmem:[%s226_s28] sm:$0xff] %v271_v0 }
  0x35   : > { %274 = vst [vmem:[%s226_s28 + $0x8] sm:$0xff] %v273_v1 }
  0x36 PF: > { %p710_p0 = scmp.ge.s32.totalorder %s1033_s13, 1  ;;  %p304_p1 = scmp.lt.s32.totalorder %s1033_s13, 5 }
  0x38   : > { %p305_p2 = pnand %p710_p0, %p304_p1 }
  0x39   : > { %s311_s15 = sand.u32 (!%p305_p2), 1, %s1009_s8   ;;  %s1295_s16 = sand.u32 (!%p305_p2), 1, %s1001_s7  }
  0x3a   : > { %308 = sbr.rel (%p305_p2) target bundleno = 279 (0x117), region = 70  ;;  %s1191_s22 = sshll.u32 (!%p305_p2), %s311_s15, 4 }
  0x3b   : > { %s712_s17 = sshll.u32 (!%p305_p2), %s1295_s16, 4  ;;  %s359_s14 = sshra.s32 (!%p305_p2), %s1017_s10, 7 }
  0x3c   : > { %s364_s20 = sand.u32 (!%p305_p2), 127, %s1017_s10  ;;  %s361_s23 = sadd.s32 (!%p305_p2), %s1021_s11, %s359_s14 }
  0x3d   : > { %s713_s30 = sshll.u32 (!%p305_p2), %s361_s23, 7  ;;  %s313_s15 = scalar_lea.vmem (!%p305_p2), [#allocation6], %s1191_s22 }
  0x3e   : > { %s365_s18 = sadd.s32 (!%p305_p2), %s713_s30, %s364_s20  ;;  %s1204_s12 = scalar_lea.vmem (!%p305_p2), [#allocation7], %s712_s17 }
  0x3f   : > { %s366_s27 = sld [smem:[#allocation3 + %s365_s18]]  ;;  %p716_p4 = scmp.ne.s32.totalorder %s1017_s10, 0 }
  0x45   : > { %s714_s24 = sshll.u32 %s366_s27, 5 }
  0x46   : > { %p368_p3 = scmp.lt.s32.totalorder %s714_s24, 63  ;;  %386 = sbr.rel (%p716_p4) target bundleno = 78 (0x4e), region = 78 }
  0x48   : > { %s1322_s24 = smov (!%p368_p3, %s714_s24), 63 }
  0x49   : > { %s715_s26 = sshll.u32 %s1322_s24, 2 }
  0x4a   : > { %s1201_s8 = scalar_lea.vmem %s1287_s4, %s715_s26 }
  0x4b   : > { %v896_v2 = vld [vmem:[%s1288_s5] ss:$0 sm:$0xff] }
  0x4c   : > { %391 = vst [vmem:[%s1204_s12] sm:$0xff] %v896_v2 }
  0x4d   : > { %392 = vst [vmem:[%s1204_s12 + $0x8] sm:$0xff] %v896_v2 }
  0x4e PF: > { %s393_s20 = sld [smem:[#allocation4 + %s1021_s11]] }
  0x54   : > { %p717_p5 = scmp.ge.s32.totalorder %s1017_s10, %s393_s20 }
  0x55   : > { %s404_s3 = sld [smem:[#allocation5]] (!%p717_p5) }
  0x56   : > { %397 = sbr.rel (%p717_p5) target bundleno = 263 (0x107), region = 82 }
  0x5b   : > { %v795_v3 = vld [vmem:[%s1201_s8 + $0x38] sm:$0xff]  ;;  %v794_v5 = vld [vmem:[%s1201_s8 + $0x30] sm:$0xff]  ;;  %v793_v7 = vld [vmem:[%s1201_s8 + $0x28] sm:$0xff]  ;;  %v405_v17 = vstv %s404_s3 }
  0x5c   : > { %v803_v4 = vld [vmem:[%s1201_s8 + $0x78] sm:$0xff]  ;;  %554 = vmatpush.bf16.msra.mxu0 %v795_v3  ;;  %v802_v6 = vld [vmem:[%s1201_s8 + $0x70] sm:$0xff]  ;;  %v801_v8 = vld [vmem:[%s1201_s8 + $0x68] sm:$0xff] }
  0x5d   : > { %568 = vmatpush.bf16.msra.mxu1 %v803_v4  ;;  %v398_v9 = vld [vmem:[%s313_s15] sm:$0xff]  ;;  %v399_v10 = vld [vmem:[%s313_s15 + $0x8] sm:$0xff] }
  0x5e   : > { %v792_v11 = vld [vmem:[%s1201_s8 + $0x20] sm:$0xff]  ;;  %v400_v13 = vunpack.c.l.bf16 %v398_v9  ;;  %v401_v14 = vunpack.c.h.bf16 %v398_v9  ;;  %v402_v15 = vunpack.c.l.bf16 %v399_v10  ;;  %v403_v16 = vunpack.c.h.bf16 %v399_v10  ;;  %v791_v18 = vld [vmem:[%s1201_s8 + $0x18] sm:$0xff]  ;;  %v790_v20 = vld [vmem:[%s1201_s8 + $0x10] sm:$0xff] }
  0x5f   : > { %v800_v12 = vld [vmem:[%s1201_s8 + $0x60] sm:$0xff]  ;;  %v799_v19 = vld [vmem:[%s1201_s8 + $0x58] sm:$0xff]  ;;  %v798_v21 = vld [vmem:[%s1201_s8 + $0x50] sm:$0xff] }
  0x60   : > { %555 = vmatpush.bf16.msra.mxu0 %v794_v5  ;;  %vm406_vm0 = vcmp.gt.f32.partialorder %v400_v13, %v405_v17  ;;  %vm407_vm1 = vcmp.gt.f32.partialorder %v401_v14, %v405_v17  ;;  %vm408_vm2 = vcmp.gt.f32.partialorder %v402_v15, %v405_v17  ;;  %vm409_vm3 = vcmp.gt.f32.partialorder %v403_v16, %v405_v17  ;;  %v789_v22 = vld [vmem:[%s1201_s8 + $0x8] sm:$0xff]  ;;  %v788_v30 = vld [vmem:[%s1201_s8] sm:$0xff] }
  0x61   : > { %569 = vmatpush.bf16.msra.mxu1 %v802_v6  ;;  %vm410_vm4 = vmpackc.low %vm407_vm1, %vm406_vm0  ;;  %v797_v23 = vld [vmem:[%s1201_s8 + $0x48] sm:$0xff]  ;;  %v796_v31 = vld [vmem:[%s1201_s8 + $0x40] sm:$0xff] }
  0x62   : > { %vm411_vm5 = vmpackc.low %vm409_vm3, %vm408_vm2  ;;  %v412_v24 = vsel %vm410_vm4, %v398_v9, 0  ;;  %v414_v35 = vld [vmem:[%s1204_s12] sm:$0xff]  ;;  %v415_v40 = vld [vmem:[%s1204_s12 + $0x8] sm:$0xff] }
  0x63   : > { %v413_v25 = vsel %vm411_vm5, %v399_v10, 0  ;;  %v450_v26 = vunpack.c.l.b16 %v412_v24  ;;  %v451_v28 = vunpack.c.h.b16 %v412_v24 }
  0x64   : > { %556 = vmatpush.bf16.msra.mxu0 %v793_v7  ;;  %v452_v27 = vunpack.c.l.b16 %v413_v25  ;;  %v453_v29 = vunpack.c.h.b16 %v413_v25 }
  0x65   : > { %570 = vmatpush.bf16.msra.mxu1 %v801_v8 }
  0x66   : > { %v454_v32 = vpack.c.b16 %v452_v27, %v450_v26  ;;  %v455_v33 = vpack.c.b16 %v453_v29, %v451_v28 }
  0x68   : > { %557 = vmatpush.bf16.msra.mxu0 %v792_v11 }
  0x69   : > { %571 = vmatpush.bf16.msra.mxu1 %v800_v12 }
  0x6c   : > { %558 = vmatpush.bf16.msra.mxu0 %v791_v18 }
  0x6d   : > { %572 = vmatpush.bf16.msra.mxu1 %v799_v19 }
  0x70   : > { %559 = vmatpush.bf16.msra.mxu0 %v790_v20 }
  0x71   : > { %573 = vmatpush.bf16.msra.mxu1 %v798_v21 }
  0x74   : > { %560 = vmatpush.bf16.msra.mxu0 %v789_v22 }
  0x75   : > { %574 = vmatpush.bf16.msra.mxu1 %v797_v23 }
  0x78   : > { %561 = vmatpush.bf16.msra.mxu0 %v788_v30 }
  0x79   : > { %575 = vmatpush.bf16.msra.mxu1 %v796_v31 }
  0x7b   : > { %562 = vmatmul.bf16.vlgmr.msra.gmra.mxu0 %v454_v32 }
  0x7c   : > { %576 = vmatmul.bf16.vlgmr.msra.gmra.mxu1 %v455_v33 }
  0xf8   : > { %v563_v34 = vpop.f32.mrf.mxu0 }
  0xf9   : > { %v577_v36 = vpop.f32.mrf.mxu1 }
  0xfa   : > { %v578_v37 = vadd.f32 %v577_v36, %v563_v34 }
  0xfc   : > { %v582_v38 = vadd.f32 %v578_v37, %v414_v35 }
  0xfe   : > { %584 = vst [vmem:[%s1204_s12] sm:$0xff] %v582_v38 }
 0x100   : > { %v565_v39 = vpop.f32.mrf.mxu0 }
 0x101   : > { %v579_v41 = vpop.f32.mrf.mxu1 }
 0x102   : > { %v580_v42 = vadd.f32 %v579_v41, %v565_v39 }
 0x104   : > { %v583_v43 = vadd.f32 %v580_v42, %v415_v40 }
 0x106   : > { %585 = vst [vmem:[%s1204_s12 + $0x8] sm:$0xff] %v583_v43 }
 0x107 PF: > { %s804_s10 = sshll.u32 %s1021_s11, 4  ;;  %s599_s23 = sshll.u32 %s1204_s12, 4  ;;  %s600_s23 = int_to_ptr.vmem [resolvable:$true] %s599_s23 }
 0x108   : > { %s598_s17 = scalar_lea.hbm %s1289_s6, %s804_s10  ;;  %s1304_s18 = sand.u32 1, %s1001_s7  }
 0x109   : > { %s601_s30 = sshll.u32 %s598_s17, 4  ;;  %s587_s27 = scalar_lea.sflag [#allocation8], %s1304_s18  ;;  %s602_s30 = int_to_ptr.hbm [resolvable:$true] %s601_s30 }
 0x10a   : > { %s935_s24 = sshra.s32 %s602_s30, 4  ;;  %s941_s11 = scalar_lea.hbm %s1289_s6, 32  ;;  %s936_s24 = int_to_ptr.hbm [resolvable:$true] %s935_s24 }
 0x10b   : > { %s937_s26 = scalar_lea.hbm %s936_s24, 16  ;;  %p942_p9 = scmp.lt.s32.totalorder %s936_s24, %s1289_s6 }
 0x10c   : > { %p938_p6 = scmp.ne.s32.totalorder %s936_s24, %s937_s26  ;;  %p943_p12 = scmp.lt.s32.totalorder %s941_s11, %s937_s26 }
 0x10e   : > { %p939_p7 = pnand %p938_p6, %p1167_p10  ;;  %p944_p13 = por %p943_p12, %p942_p9 }
 0x110   : > { %p940_p8 = pneg %p939_p7 }
 0x112   : > { %p945_p0 = pnand %p944_p13, %p940_p8 }
 0x114   : > { %948 = shalt.err (!%p945_p0)
}
 0x115   : > { %s1037_s12 = smov 128   ;;  %s1038_s20 = smov 8  }
 0x116   : > { %805 = dma.vmem_to_hbm [thread:$0]  (%p1167_p10), %s600_s23, 256, %s602_s30, %s587_s27, %s1037_s12, %s1037_s12, %s1038_s20  }
 0x117 PF: > { %p811_p1 = scmp.ge.s32.totalorder %s1033_s13, 2  ;;  %s616_s3 = sand.u32 1, %s997_s0  }
 0x118   : > { %s617_s10 = scalar_lea.sflag [#allocation8], %s616_s3 }
 0x119   : > { %p808_p2 = pnand %p811_p1, %p1171_p11 }
 0x11b   : > { %p809_p3 = pneg %p808_p2 }
 0x11d   : > { %992 = dma.done.wait (%p809_p3), %s617_s10, 256  }
 0x11e   : > { %994 = vsyncadd (%p809_p3), %s617_s10, 4294967040  ;;  %s33_s13 = sadd.s32 1, %s1033_s13   ;;  %s1305_s11 = sld [smem:[#allocation11_spill]] }
 0x11f   : > { %p30_p4 = scmp.ge.s32.totalorder %s33_s13, 6   ;;  %s1306_s21 = sld [smem:[#allocation12_spill]] }
 0x120   : > { %s1307_s12 = sld [smem:[#allocation13_spill]]  ;;  %s1308_s0 = smov %s1001_s7 }
 0x121   : > { %s1309_s7 = smov %s1005_s1  ;;  %s1310_s1 = smov %s1161_s19 }
 0x122   : > { %s1311_s8 = smov %s1013_s9  ;;  %s1312_s9 = smov %s1177_s29 }
 0x123   : > { %s1313_s10 = smov %s1025_s2  ;;  %32 = sbr.rel (!%p30_p4) target bundleno = 14 (0xe), region = 125 }
 0x125   : > { %s1314_s2 = smov %s1306_s21 }
 0x128   :  { %623 = vsyncpa [#allocation8], 1 }
 0x129   :  { %625 = vsyncpa [#allocation8 + $0x1], 1 }

</bundles_post_ra>
